<compile_context>
chip_gen: v7x
topology: tpu7x:2x2x1
jax: 0.10.0
libtpu: 0.0.40
codegen_flags: <defaults>
</compile_context>

<pallas_src>
import jax
import jax.numpy as jnp
from jax.experimental import pallas as pl
from jax.experimental.pallas import tpu as pltpu

INPUT_DIM = 206
HIDDEN = 1024
FC2_PAD = 128             # lane-padded width of the fc2 weight matrix (MXU path)
LEAKY_ALPHA = 1.0 / 5.5   # ReLUMixin leaky slope (module uses 1/5.5, not torch's 0.01)


def _round_up(n, m):
    return ((n + m - 1) // m) * m


def _fc2_on_mxu() -> bool:
    """v6e/v7x: MXU has slack while the VALU binds -> fc2 on the MXU.
    v5e: MXU-bound and no bf16 VALU -> keep fc2 on the VPU/XLU."""
    try:
        kind = jax.devices()[0].device_kind.lower()
    except Exception:
        return True
    return not ("v5e" in kind or "v5 lite" in kind or "v5lite" in kind)


def _kernel_fc2_mxu(x_ref, w1_ref, b1_ref, w2_ref, b2_ref, o_ref):
    # fc1 on the MXU: x cast to bf16 in-kernel (no wrapper pre-pass), f32 acc.
    xb = x_ref[...].astype(jnp.bfloat16)
    h = jnp.dot(xb, w1_ref[...], preferred_element_type=jnp.float32) + b1_ref[...]
    # leaky_relu(alpha=1/5.5): max(h, a*h) == where(h>0, h, a*h) since 0 < a < 1.
    h = jnp.maximum(h, LEAKY_ALPHA * h)
    # fc (1024 -> 1) on the MXU: (H, 128) bf16 matrix whose column 0 is w2;
    # keeps the saturated VALU free on v6e/v7x.
    o2 = jnp.dot(h.astype(jnp.bfloat16), w2_ref[...],
                 preferred_element_type=jnp.float32)
    o_ref[...] = (o2[:, 0:1] + b2_ref[...]).astype(o_ref.dtype)


def _kernel_fc2_vpu(x_ref, w1_ref, b1_ref, w2_ref, b2_ref, o_ref):
    xb = x_ref[...].astype(jnp.bfloat16)
    h = jnp.dot(xb, w1_ref[...], preferred_element_type=jnp.float32) + b1_ref[...]
    h = jnp.maximum(h, LEAKY_ALPHA * h)
    # fc (1024 -> 1): VPU multiply against the (1, H) w2 row + XLU lane reduce
    # (v5e is MXU-bound; the VALU/XLU have slack there).
    out = jnp.sum(h * w2_ref[...], axis=-1, keepdims=True) + b2_ref[...]
    o_ref[...] = out.astype(o_ref.dtype)


def _choose_tile(B, block_b):
    """Adaptive batch tile: minimizes dead-row padding and guarantees >=2 grid
    tiles once B >= 512 so the 'parallel' batch axis can shard across both v7x
    TensorCores (one extra ~0.35us step on 1-TC chips, negligible)."""
    min_tiles = 2 if B >= 512 else 1
    nt = max(pl.cdiv(B, block_b), min_tiles)
    tb = _round_up(pl.cdiv(B, nt), 8)
    nt = pl.cdiv(B, tb)
    return tb, nt


def nn_classifier_forward(x, w1, b1, w2_row, b2, *, block_b=2048, fc2_on_mxu=None):
    """Eval-mode NNClassifier.forward.

    x:      (B, INPUT_DIM) float
    w1:     (INPUT_DIM, HIDDEN) fc1 weight, pre-transposed to (in, out)
    b1:     (1, HIDDEN)
    w2_row: (1, HIDDEN)   fc weight as a row
    b2:     (1, 1)
    Returns (B,) float32  (== torch.squeeze(fc(...), 1)).
    """
    B, D = x.shape
    assert w1.shape[0] == D
    H = w1.shape[1]

    if x.dtype != jnp.float32:
        x = x.astype(jnp.float32)
    w1 = w1.astype(jnp.bfloat16)          # weights at rest in bf16, f32 MXU acc
    b1 = b1.astype(jnp.float32)
    b2 = b2.astype(jnp.float32)

    if fc2_on_mxu is None:
        fc2_on_mxu = _fc2_on_mxu()

    if fc2_on_mxu:
        kernel = _kernel_fc2_mxu
        w2_arg = jnp.zeros((H, FC2_PAD), jnp.bfloat16).at[:, 0].set(
            w2_row[0].astype(jnp.bfloat16))
        w2_spec = pl.BlockSpec((H, FC2_PAD), lambda i: (0, 0),
                               pipeline_mode=pl.Buffered(1))
        w2_bytes = H * FC2_PAD * 2
    else:
        kernel = _kernel_fc2_vpu
        w2_arg = w2_row.astype(jnp.float32)
        w2_spec = pl.BlockSpec((1, H), lambda i: (0, 0),
                               pipeline_mode=pl.Buffered(1))
        w2_bytes = H * 4

    tb, num_tiles = _choose_tile(B, block_b)
    # x is streamed raw-f32 with a full-feature-width (tb, 206) block; a ragged
    # last tile (B % tb != 0) is handled by Pallas block masking (no wrapper pad).

    # VMEM budget: double-buffered x/out tiles, single-buffered weights, f32
    # hidden + fc2 result, plus headroom.  Capped at 48 MiB so the same kernel
    # fits v7x's 64 MiB physical VMEM (and is well under v5e/v6e's 128 MiB).
    vmem_bytes = (
        2 * tb * D * 4          # x tiles (f32, double buffered)
        + tb * D * 2            # in-kernel bf16 copy of x
        + D * H * 2             # w1 (bf16, single buffered)
        + (H + 1) * 4 + w2_bytes  # b1, b2, w2
        + tb * H * 4            # hidden intermediate (f32)
        + tb * FC2_PAD * 4      # fc2 MXU result (f32)
        + 2 * tb * 4            # out column (f32, double buffered)
    )
    vmem_limit = int(min(48 << 20, max(16 << 20, vmem_bytes + (8 << 20))))

    out = pl.pallas_call(
        kernel,
        out_shape=jax.ShapeDtypeStruct((B, 1), jnp.float32),
        grid_spec=pltpu.PrefetchScalarGridSpec(
            num_scalar_prefetch=0,
            grid=(num_tiles,),
            in_specs=[
                pl.BlockSpec((tb, D), lambda i: (i, 0)),            # x: batch stream
                pl.BlockSpec((D, H), lambda i: (0, 0),
                             pipeline_mode=pl.Buffered(1)),         # w1: grid-invariant
                pl.BlockSpec((1, H), lambda i: (0, 0),
                             pipeline_mode=pl.Buffered(1)),         # b1
                w2_spec,                                            # w2
                pl.BlockSpec((1, 1), lambda i: (0, 0),
                             pipeline_mode=pl.Buffered(1)),         # b2
            ],
            out_specs=pl.BlockSpec((tb, 1), lambda i: (i, 0)),
        ),
        compiler_params=pltpu.CompilerParams(
            dimension_semantics=("parallel",),   # batch tiles independent (megacore)
            vmem_limit_bytes=vmem_limit,
        ),
    )(x, w1, b1, w2_arg, b2)

    # TODO(synk): lane-dense (num_tiles, tb) output layout deferred -- the (tb, 1)
    #             masked stores are far below the per-tile VALU/MXU budget.
    # TODO(synk): for small-B, many-call serving, keep w1 resident across calls
    #             (cross-call prefetch) instead of re-streaming weights per call.
    return jnp.squeeze(out, axis=1)   # torch.squeeze(x, 1): (B, 1) -> (B,)


if __name__ == "__main__":
    key = jax.random.PRNGKey(0)
    kx, k1, k2, k3, k4 = jax.random.split(key, 5)

    B = 8  # small deterministic test batch
    x = jax.random.normal(kx, (B, INPUT_DIM), jnp.float32)

    # torch.nn.Linear-style init: U(-1/sqrt(fan_in), +1/sqrt(fan_in)).
    bound1 = float(1.0 / (INPUT_DIM ** 0.5))
    bound2 = float(1.0 / (HIDDEN ** 0.5))
    w1 = jax.random.uniform(k1, (INPUT_DIM, HIDDEN), jnp.float32, -bound1, bound1)
    b1 = jax.random.uniform(k2, (1, HIDDEN), jnp.float32, -bound1, bound1)
    w2_row = jax.random.uniform(k3, (1, HIDDEN), jnp.float32, -bound2, bound2)
    b2 = jax.random.uniform(k4, (1, 1), jnp.float32, -bound2, bound2)

    out = nn_classifier_forward(x, w1, b1, w2_row, b2)
    out = jax.block_until_ready(out)

    # Full-f32 reference (matches the PyTorch module's numerics; the kernel
    # differs only by bf16 quantization of the matmul inputs).
    h_ref = x @ w1 + b1
    h_ref = jnp.where(h_ref > 0, h_ref, LEAKY_ALPHA * h_ref)
    ref = jnp.squeeze(h_ref @ w2_row.T + b2, axis=1)

    assert out.shape == (B,), out.shape
    assert jnp.allclose(out, ref, atol=3e-2, rtol=3e-2), (out, ref)

    print("KERNEL_OK")
</pallas_src>

<mosaic_0001>
module attributes {stable_mosaic.version = 11 : i64} {
  func.func @_kernel_fc2_mxu(%arg0: i32, %arg1: memref<8x206xf32, #tpu.memory_space<vmem>>, %arg2: memref<206x1024xbf16, #tpu.memory_space<vmem>>, %arg3: memref<1x1024xf32, #tpu.memory_space<vmem>>, %arg4: memref<1024x128xbf16, #tpu.memory_space<vmem>>, %arg5: memref<1x1xf32, #tpu.memory_space<vmem>>, %arg6: memref<8x1xf32, #tpu.memory_space<vmem>>) attributes {dimension_semantics = [#tpu.dimension_semantics<parallel>], iteration_bounds = array<i64: 1>, scalar_prefetch = 0 : i64, scratch_operands = 0 : i64, tpu.core_type = #tpu.core_type<tc>, window_params = [{transform_indices = @transform_0, window_bounds = array<i64: 8, 206>}, {pipeline_mode = #tpu.pipeline_mode<synchronous>, transform_indices = @transform_1, window_bounds = array<i64: 206, 1024>}, {pipeline_mode = #tpu.pipeline_mode<synchronous>, transform_indices = @transform_2, window_bounds = array<i64: 1, 1024>}, {pipeline_mode = #tpu.pipeline_mode<synchronous>, transform_indices = @transform_3, window_bounds = array<i64: 1024, 128>}, {pipeline_mode = #tpu.pipeline_mode<synchronous>, transform_indices = @transform_4, window_bounds = array<i64: 1, 1>}, {transform_indices = @transform_5, window_bounds = array<i64: 8, 1>}]} {
    %c0 = arith.constant 0 : index
    %c0_0 = arith.constant 0 : index
    %0 = vector.load %arg1[%c0, %c0_0] : memref<8x206xf32, #tpu.memory_space<vmem>>, vector<8x206xf32>
    %1 = arith.truncf %0 : vector<8x206xf32> to vector<8x206xbf16>
    %c0_1 = arith.constant 0 : index
    %c0_2 = arith.constant 0 : index
    %2 = vector.load %arg2[%c0_1, %c0_2] : memref<206x1024xbf16, #tpu.memory_space<vmem>>, vector<206x1024xbf16>
    %cst = arith.constant dense<0.000000e+00> : vector<8x1024xf32>
    %3 = tpu.matmul %1, %2, %cst {dimension_numbers = #tpu.dot_dimension_numbers<[1], [0], [0], [1], [0, 0, 1, 1], [], []>} : vector<8x206xbf16>, vector<206x1024xbf16>, vector<8x1024xf32> -> vector<8x1024xf32>
    %c0_3 = arith.constant 0 : index
    %c0_4 = arith.constant 0 : index
    %4 = vector.load %arg3[%c0_3, %c0_4] : memref<1x1024xf32, #tpu.memory_space<vmem>>, vector<1x1024xf32>
    %5 = vector.broadcast %4 : vector<1x1024xf32> to vector<8x1024xf32>
    %6 = arith.addf %3, %5 : vector<8x1024xf32>
    %cst_5 = arith.constant 0.181818187 : f32
    %7 = vector.broadcast %cst_5 : f32 to vector<8x1024xf32>
    %8 = arith.mulf %7, %6 : vector<8x1024xf32>
    %9 = arith.maximumf %6, %8 : vector<8x1024xf32>
    %10 = arith.truncf %9 : vector<8x1024xf32> to vector<8x1024xbf16>
    %c0_6 = arith.constant 0 : index
    %c0_7 = arith.constant 0 : index
    %11 = vector.load %arg4[%c0_6, %c0_7] : memref<1024x128xbf16, #tpu.memory_space<vmem>>, vector<1024x128xbf16>
    %cst_8 = arith.constant dense<0.000000e+00> : vector<8x128xf32>
    %12 = tpu.matmul %10, %11, %cst_8 {dimension_numbers = #tpu.dot_dimension_numbers<[1], [0], [0], [1], [0, 0, 1, 1], [], []>} : vector<8x1024xbf16>, vector<1024x128xbf16>, vector<8x128xf32> -> vector<8x128xf32>
    %13 = vector.extract_strided_slice %12 {offsets = [0, 0], sizes = [8, 1], strides = [1, 1]} : vector<8x128xf32> to vector<8x1xf32>
    %c0_9 = arith.constant 0 : index
    %c0_10 = arith.constant 0 : index
    %14 = vector.load %arg5[%c0_9, %c0_10] : memref<1x1xf32, #tpu.memory_space<vmem>>, vector<1x1xf32>
    %15 = vector.broadcast %14 : vector<1x1xf32> to vector<8x1xf32>
    %16 = arith.addf %13, %15 : vector<8x1xf32>
    %c0_11 = arith.constant 0 : index
    %c0_12 = arith.constant 0 : index
    %17 = vector.load %arg6[%c0_11, %c0_12] : memref<8x1xf32, #tpu.memory_space<vmem>>, vector<8x1xf32>
    tpu.vector_store %arg6[%c0_11, %c0_12], %16 {strides = array<i32>} : memref<8x1xf32, #tpu.memory_space<vmem>>, vector<8x1xf32>,
    return
  }
  func.func @transform_0(%arg0: i32) -> (i32, i32) {
    %c0_i32 = arith.constant 0 : i32
    %c0_i32_0 = arith.constant 0 : i32
    return %arg0, %c0_i32 : i32, i32
  }
  func.func @transform_1(%arg0: i32) -> (i32, i32) {
    %c0_i32 = arith.constant 0 : i32
    %c0_i32_0 = arith.constant 0 : i32
    %c0_i32_1 = arith.constant 0 : i32
    return %c0_i32, %c0_i32_0 : i32, i32
  }
  func.func @transform_2(%arg0: i32) -> (i32, i32) {
    %c0_i32 = arith.constant 0 : i32
    %c0_i32_0 = arith.constant 0 : i32
    %c0_i32_1 = arith.constant 0 : i32
    return %c0_i32, %c0_i32_0 : i32, i32
  }
  func.func @transform_3(%arg0: i32) -> (i32, i32) {
    %c0_i32 = arith.constant 0 : i32
    %c0_i32_0 = arith.constant 0 : i32
    %c0_i32_1 = arith.constant 0 : i32
    return %c0_i32, %c0_i32_0 : i32, i32
  }
  func.func @transform_4(%arg0: i32) -> (i32, i32) {
    %c0_i32 = arith.constant 0 : i32
    %c0_i32_0 = arith.constant 0 : i32
    %c0_i32_1 = arith.constant 0 : i32
    return %c0_i32, %c0_i32_0 : i32, i32
  }
  func.func @transform_5(%arg0: i32) -> (i32, i32) {
    %c0_i32 = arith.constant 0 : i32
    %c0_i32_0 = arith.constant 0 : i32
    return %arg0, %c0_i32 : i32, i32
  }
}

</mosaic_0001>

<bundles_post_ra>
// kernel: tpu_custom_call.1
= control target key start
LH: loop header
LB: loop body
LE: loop exit
PB: predicated region body
PF: predicated region fallthrough
CT: control target
= control target key end

     0   :  { %s2161_s0 = inlined_call_operand.hbm [shape: f32[8,206], index: 0, kind: input, shape index: {}]   ;;  %s2162_s1 = inlined_call_operand.hbm [shape: bf16[206,1024], index: 1, kind: input, shape index: {}]   ;;  %s2163_s2 = inlined_call_operand.vmem [shape: f32[1,1024], index: 2, kind: input, shape index: {}]   ;;  %s2164_s3 = inlined_call_operand.hbm [shape: bf16[1024,128], index: 3, kind: input, shape index: {}]   ;;  %s2165_s4 = inlined_call_operand.<no memory space> [shape: f32[1,1], index: 4, kind: input, shape index: {}]   ;;  %s2166_s5 = inlined_call_operand.vmem [shape: f32[8,1], index: 5, kind: output, shape index: {}]  }
   0x1   :  { %v10_v0 = vstv %s2165_s4 }
   0x2   :  { %11 = vst [vmem:[#allocation2] sm:$0x1] %v10_v0 }
   0x3   :  { %12 = vsyncpa [#allocation4], 0 }
   0x4   :  { %13 = vsyncpa [#allocation6], 0  ;;  %s2035_s20 = smov [#allocation5]   ;;  %s1965_s24 = scalar_lea.hbm %s2162_s1, 13312 }
   0x5   :  { %s29_s21 = sshll.u32 %s2035_s20, 4  ;;  %p1966_p0 = scmp.ne.s32.totalorder %s2162_s1, %s1965_s24  ;;  %s30_s21 = int_to_ptr.vmem [resolvable:$true] %s29_s21 }
   0x6   :  { %p1969_p1 = scmp.lt.u32.totalorder %s1965_s24, %s2162_s1 }
   0x8   :  { %p1971_p2 = pnand %p1969_p1, %p1966_p0 }
   0xa   :  { %1974 = shalt.err (!%p1971_p2)
}
   0xb   :  { %s1975_s4 = scalar_lea.vmem %s30_s21, 13312  ;;  %p1980_p4 = scmp.lt.s32.totalorder %s30_s21, %s30_s21 }
   0xc   :  { %p1976_p3 = scmp.ne.s32.totalorder %s30_s21, %s1975_s4  ;;  %p1981_p5 = scmp.lt.s32.totalorder %s1975_s4, %s1975_s4 }
   0xe   :  { %p1982_p6 = por %p1981_p5, %p1980_p4 }
  0x10   :  { %p1983_p7 = pnand %p1982_p6, %p1976_p3 }
  0x12   :  { %1986 = shalt.err (!%p1983_p7)
}
  0x13   :  { %s2036_s29 = smov 512   ;;  %s2037_s30 = smov 32  }
  0x14   :  { %35 = dma.hbm_to_vmem [thread:$0]  %s2162_s1, 13312, %s30_s21, [#allocation6], %s2036_s29, %s2036_s29, %s2037_s30  }
  0x15   :  { %s2038_s8 = smov [#allocation3]   ;;  %s2039_s10 = smov [#allocation7]  }
  0x16   :  { %s20_s9 = sshll.u32 %s2038_s8, 4  ;;  %s43_s11 = sshll.u32 %s2039_s10, 4  ;;  %s21_s9 = int_to_ptr.vmem [resolvable:$true] %s20_s9  ;;  %s44_s11 = int_to_ptr.vmem [resolvable:$true] %s43_s11 }
  0x17   :  { %s1987_s14 = scalar_lea.hbm %s2161_s0, 256 }
  0x18   :  { %p1988_p8 = scmp.ne.s32.totalorder %s2161_s0, %s1987_s14  ;;  %p1991_p9 = scmp.lt.u32.totalorder %s1987_s14, %s2161_s0 }
  0x1a   :  { %p1993_p10 = pnand %p1991_p9, %p1988_p8 }
  0x1c   :  { %1996 = shalt.err (!%p1993_p10)
}
  0x1d   :  { %s1997_s1 = scalar_lea.vmem %s21_s9, 256  ;;  %p2002_p12 = scmp.lt.s32.totalorder %s21_s9, %s21_s9 }
  0x1e   :  { %p1998_p11 = scmp.ne.s32.totalorder %s21_s9, %s1997_s1  ;;  %p2003_p13 = scmp.lt.s32.totalorder %s1997_s1, %s1997_s1 }
  0x20   :  { %p2004_p0 = por %p2003_p13, %p2002_p12 }
  0x22   :  { %p2005_p1 = pnand %p2004_p0, %p1998_p11 }
  0x24   :  { %2008 = shalt.err (!%p2005_p1)
}
  0x25   :  { %23 = dma.hbm_to_vmem [thread:$0]  %s2161_s0, 256, %s21_s9, [#allocation4]  }
  0x26   :  { %s2009_s23 = scalar_lea.hbm %s2164_s3, 8192 }
  0x27   :  { %p2010_p2 = scmp.ne.s32.totalorder %s2164_s3, %s2009_s23  ;;  %p2013_p3 = scmp.lt.u32.totalorder %s2009_s23, %s2164_s3 }
  0x29   :  { %p2015_p4 = pnand %p2013_p3, %p2010_p2 }
  0x2b   :  { %2018 = shalt.err (!%p2015_p4)
}
  0x2c   :  { %s2019_s28 = scalar_lea.vmem %s44_s11, 8192  ;;  %p2024_p6 = scmp.lt.s32.totalorder %s44_s11, %s44_s11 }
  0x2d   :  { %p2020_p5 = scmp.ne.s32.totalorder %s44_s11, %s2019_s28  ;;  %p2025_p7 = scmp.lt.s32.totalorder %s2019_s28, %s2019_s28 }
  0x2f   :  { %p2026_p8 = por %p2025_p7, %p2024_p6 }
  0x31   :  { %p2027_p9 = pnand %p2026_p8, %p2020_p5 }
  0x33   :  { %2030 = shalt.err (!%p2027_p9)
}
  0x34   :  { %s2040_s0 = smov 64   ;;  %s2041_s4 = smov 4  }
  0x35   :  { %49 = dma.hbm_to_vmem [thread:$0]  %s2164_s3, 8192, %s44_s11, [#allocation6], %s2040_s0, %s2040_s0, %s2041_s4  }
  0x36   :  { %2031 = dma.done.wait [#allocation4], 256  }
  0x37   :  { %2032 = vsyncadd [#allocation4], 4294967040 }
  0x38   :  { %2033 = dma.done.wait [#allocation6], 21504  }
  0x39   :  { %2034 = vsyncadd [#allocation6], 4294945792  ;;  %v66_v1 = vld [vmem:[#allocation5] sm:$0xff]  ;;  %v67_v3 = vld [vmem:[#allocation5 + $0x8] sm:$0xff]  ;;  %vm724_vm0 = vcmask 637952   ;;  %vm728_vm1 = vcmask 1046528  }
  0x3a   :  { %v70_v2 = vld [vmem:[#allocation5 + $0x20] sm:$0xff]  ;;  %v71_v5 = vld [vmem:[#allocation5 + $0x28] sm:$0xff]  ;;  %v63_v46 = vld [vmem:[#allocation3 + $0x8] sm:$0xff]  ;;  %vm1621_vm2 = vcmask 7168  }
  0x3b   :  { %v1630_v4 = vcombine.high %v66_v1, %v70_v2  ;;  %v1629_v6 = vcombine.low %v66_v1, %v70_v2  ;;  %v74_v7 = vld [vmem:[#allocation5 + $0x40] sm:$0xff]  ;;  %v1632_v9 = vcombine.high %v67_v3, %v71_v5  ;;  %v1631_v10 = vcombine.low %v67_v3, %v71_v5  ;;  %v75_v12 = vld [vmem:[#allocation5 + $0x48] sm:$0xff] }
  0x3c   :  { %v78_v8 = vld [vmem:[#allocation5 + $0x60] sm:$0xff]  ;;  %v79_v13 = vld [vmem:[#allocation5 + $0x68] sm:$0xff]  ;;  %v2111_v50 = vpack.c.bf16 %v63_v46, %v63_v46  ;;  %v69_v46 = vld [vmem:[#allocation5 + $0x18] sm:$0xff] }
  0x3d   :  { %v1638_v11 = vcombine.high %v74_v7, %v78_v8  ;;  %v82_v14 = vld [vmem:[#allocation5 + $0x80] sm:$0xff]  ;;  %753 = vmatprep.subr.bf16.mxu0 %v1630_v4  ;;  %v1640_v15 = vcombine.high %v75_v12, %v79_v13  ;;  %v83_v17 = vld [vmem:[#allocation5 + $0x88] sm:$0xff]  ;;  %794 = vmatprep.subr.bf16.mxu1 %v1632_v9  ;;  %v1637_v19 = vcombine.low %v74_v7, %v78_v8 }
  0x3e   :  { %v86_v16 = vld [vmem:[#allocation5 + $0xa0] sm:$0xff]  ;;  %v87_v18 = vld [vmem:[#allocation5 + $0xa8] sm:$0xff]  ;;  %754 = vmatpush1.bf16.msra.mxu0 %v1629_v6  ;;  %795 = vmatpush1.bf16.msra.mxu1 %v1631_v10  ;;  %v1639_v20 = vcombine.low %v75_v12, %v79_v13 }
  0x3f   :  { %755 = vmatprep.subr.bf16.mxu0 %v1638_v11  ;;  %v1646_v21 = vcombine.high %v82_v14, %v86_v16  ;;  %796 = vmatprep.subr.bf16.mxu1 %v1640_v15  ;;  %v1648_v22 = vcombine.high %v83_v17, %v87_v18  ;;  %v90_v23 = vld [vmem:[#allocation5 + $0xc0] sm:$0xff]  ;;  %v91_v25 = vld [vmem:[#allocation5 + $0xc8] sm:$0xff]  ;;  %v1645_v27 = vcombine.low %v82_v14, %v86_v16 }
  0x40   :  { %v94_v24 = vld [vmem:[#allocation5 + $0xe0] sm:$0xff]  ;;  %v95_v26 = vld [vmem:[#allocation5 + $0xe8] sm:$0xff]  ;;  %v1647_v28 = vcombine.low %v83_v17, %v87_v18  ;;  %1734 = vmatprep.mubr.msk.bf16.mxu0 %vm724_vm0, %v2111_v50  ;;  %1736 = vmatprep.mubr.msk.bf16.mxu1 %vm724_vm0, %v2111_v50 }
  0x41   :  { %v1654_v29 = vcombine.high %v90_v23, %v94_v24  ;;  %v1656_v30 = vcombine.high %v91_v25, %v95_v26  ;;  %v98_v31 = vld [vmem:[#allocation5 + $0x100] sm:$0xff]  ;;  %v99_v33 = vld [vmem:[#allocation5 + $0x108] sm:$0xff]  ;;  %v1653_v35 = vcombine.low %v90_v23, %v94_v24  ;;  %v1655_v36 = vcombine.low %v91_v25, %v95_v26 }
  0x42   :  { %756 = vmatpush1.bf16.msra.mxu0 %v1637_v19  ;;  %797 = vmatpush1.bf16.msra.mxu1 %v1639_v20  ;;  %v102_v32 = vld [vmem:[#allocation5 + $0x120] sm:$0xff]  ;;  %v103_v34 = vld [vmem:[#allocation5 + $0x128] sm:$0xff] }
  0x43   :  { %757 = vmatprep.subr.bf16.mxu0 %v1646_v21  ;;  %798 = vmatprep.subr.bf16.mxu1 %v1648_v22  ;;  %v1662_v37 = vcombine.high %v98_v31, %v102_v32  ;;  %v1664_v38 = vcombine.high %v99_v33, %v103_v34  ;;  %v106_v39 = vld [vmem:[#allocation5 + $0x140] sm:$0xff]  ;;  %v107_v41 = vld [vmem:[#allocation5 + $0x148] sm:$0xff]  ;;  %v1661_v43 = vcombine.low %v98_v31, %v102_v32 }
  0x44   :  { %v110_v40 = vld [vmem:[#allocation5 + $0x160] sm:$0xff]  ;;  %v111_v42 = vld [vmem:[#allocation5 + $0x168] sm:$0xff]  ;;  %v1663_v44 = vcombine.low %v99_v33, %v103_v34 }
  0x45   :  { %v1670_v45 = vcombine.high %v106_v39, %v110_v40  ;;  %v1672_v47 = vcombine.high %v107_v41, %v111_v42  ;;  %v114_v48 = vld [vmem:[#allocation5 + $0x180] sm:$0xff]  ;;  %v115_v51 = vld [vmem:[#allocation5 + $0x188] sm:$0xff]  ;;  %v1669_v53 = vcombine.low %v106_v39, %v110_v40  ;;  %v1671_v54 = vcombine.low %v107_v41, %v111_v42  ;;  %v72_v42 = vld [vmem:[#allocation5 + $0x30] sm:$0xff] }
  0x46   :  { %758 = vmatpush1.bf16.msra.mxu0 %v1645_v27  ;;  %799 = vmatpush1.bf16.msra.mxu1 %v1647_v28  ;;  %v118_v49 = vld [vmem:[#allocation5 + $0x1a0] sm:$0xff]  ;;  %v119_v52 = vld [vmem:[#allocation5 + $0x1a8] sm:$0xff] }
  0x47   :  { %759 = vmatprep.subr.bf16.mxu0 %v1654_v29  ;;  %800 = vmatprep.subr.bf16.mxu1 %v1656_v30  ;;  %v1678_v55 = vcombine.high %v114_v48, %v118_v49  ;;  %v1680_v56 = vcombine.high %v115_v51, %v119_v52  ;;  %v122_v57 = vld [vmem:[#allocation5 + $0x1c0] sm:$0xff]  ;;  %v123_v59 = vld [vmem:[#allocation5 + $0x1c8] sm:$0xff]  ;;  %v1677_v61 = vcombine.low %v114_v48, %v118_v49  ;;  %v76_v48 = vld [vmem:[#allocation5 + $0x50] sm:$0xff] }
  0x48   :  { %v126_v58 = vld [vmem:[#allocation5 + $0x1e0] sm:$0xff]  ;;  %v127_v60 = vld [vmem:[#allocation5 + $0x1e8] sm:$0xff]  ;;  %v1679_v62 = vcombine.low %v115_v51, %v119_v52  ;;  %v80_v52 = vld [vmem:[#allocation5 + $0x70] sm:$0xff] }
  0x49   :  { %v1686_v63 = vcombine.high %v122_v57, %v126_v58  ;;  %v1688_v0 = vcombine.high %v123_v59, %v127_v60  ;;  %v130_v1 = vld [vmem:[#allocation5 + $0x200] sm:$0xff]  ;;  %v131_v3 = vld [vmem:[#allocation5 + $0x208] sm:$0xff]  ;;  %v1685_v5 = vcombine.low %v122_v57, %v126_v58  ;;  %v1687_v6 = vcombine.low %v123_v59, %v127_v60  ;;  %v81_v57 = vld [vmem:[#allocation5 + $0x78] sm:$0xff] }
  0x4a   :  { %760 = vmatpush1.bf16.msra.mxu0 %v1653_v35  ;;  %801 = vmatpush1.bf16.msra.mxu1 %v1655_v36  ;;  %v134_v2 = vld [vmem:[#allocation5 + $0x220] sm:$0xff]  ;;  %v135_v4 = vld [vmem:[#allocation5 + $0x228] sm:$0xff]  ;;  %v84_v59 = vld [vmem:[#allocation5 + $0x90] sm:$0xff] }
  0x4b   :  { %761 = vmatprep.subr.bf16.mxu0 %v1662_v37  ;;  %802 = vmatprep.subr.bf16.mxu1 %v1664_v38  ;;  %v1694_v7 = vcombine.high %v130_v1, %v134_v2  ;;  %v1696_v8 = vcombine.high %v131_v3, %v135_v4  ;;  %v138_v9 = vld [vmem:[#allocation5 + $0x240] sm:$0xff]  ;;  %v139_v11 = vld [vmem:[#allocation5 + $0x248] sm:$0xff]  ;;  %v1693_v13 = vcombine.low %v130_v1, %v134_v2  ;;  %v68_v38 = vld [vmem:[#allocation5 + $0x10] sm:$0xff] }
  0x4c   :  { %v142_v10 = vld [vmem:[#allocation5 + $0x260] sm:$0xff]  ;;  %v143_v12 = vld [vmem:[#allocation5 + $0x268] sm:$0xff]  ;;  %v1695_v14 = vcombine.low %v131_v3, %v135_v4  ;;  %v1634_v51 = vcombine.high %v68_v38, %v72_v42  ;;  %v1633_v58 = vcombine.low %v68_v38, %v72_v42  ;;  %v89_v1 = vld [vmem:[#allocation5 + $0xb8] sm:$0xff]  ;;  %v1641_v2 = vcombine.low %v76_v48, %v80_v52 }
  0x4d   :  { %v1702_v15 = vcombine.high %v138_v9, %v142_v10  ;;  %v1704_v16 = vcombine.high %v139_v11, %v143_v12  ;;  %v146_v17 = vld [vmem:[#allocation5 + $0x280] sm:$0xff]  ;;  %v147_v19 = vld [vmem:[#allocation5 + $0x288] sm:$0xff]  ;;  %v1701_v21 = vcombine.low %v138_v9, %v142_v10  ;;  %v1703_v23 = vcombine.low %v139_v11, %v143_v12  ;;  %v92_v3 = vld [vmem:[#allocation5 + $0xd0] sm:$0xff] }
  0x4e   :  { %762 = vmatpush1.bf16.msra.mxu0 %v1661_v43  ;;  %803 = vmatpush1.bf16.msra.mxu1 %v1663_v44  ;;  %v150_v18 = vld [vmem:[#allocation5 + $0x2a0] sm:$0xff]  ;;  %v151_v20 = vld [vmem:[#allocation5 + $0x2a8] sm:$0xff]  ;;  %v96_v4 = vld [vmem:[#allocation5 + $0xf0] sm:$0xff] }
  0x4f   :  { %763 = vmatprep.subr.bf16.mxu0 %v1670_v45  ;;  %804 = vmatprep.subr.bf16.mxu1 %v1672_v47  ;;  %v154_v22 = vld [vmem:[#allocation5 + $0x2c0] sm:$0xff]  ;;  %v1710_v24 = vcombine.high %v146_v17, %v150_v18  ;;  %v1712_v26 = vcombine.high %v147_v19, %v151_v20  ;;  %v155_v27 = vld [vmem:[#allocation5 + $0x2c8] sm:$0xff]  ;;  %v1709_v29 = vcombine.low %v146_v17, %v150_v18  ;;  %v62_v45 = vld [vmem:[#allocation3] sm:$0xff] }
  0x50   :  { %v158_v25 = vld [vmem:[#allocation5 + $0x2e0] sm:$0xff]  ;;  %v159_v28 = vld [vmem:[#allocation5 + $0x2e8] sm:$0xff]  ;;  %v1711_v31 = vcombine.low %v147_v19, %v151_v20  ;;  %v73_v47 = vld [vmem:[#allocation5 + $0x38] sm:$0xff]  ;;  %v1657_v18 = vcombine.low %v92_v3, %v96_v4 }
  0x51   :  { %v162_v30 = vld [vmem:[#allocation5 + $0x300] sm:$0xff]  ;;  %v1718_v32 = vcombine.high %v154_v22, %v158_v25  ;;  %v1720_v34 = vcombine.high %v155_v27, %v159_v28  ;;  %v163_v35 = vld [vmem:[#allocation5 + $0x308] sm:$0xff]  ;;  %v1717_v37 = vcombine.low %v154_v22, %v158_v25  ;;  %v1719_v39 = vcombine.low %v155_v27, %v159_v28  ;;  %v100_v11 = vld [vmem:[#allocation5 + $0x110] sm:$0xff] }
  0x52   :  { %764 = vmatpush1.bf16.msra.mxu0 %v1669_v53  ;;  %805 = vmatpush1.bf16.msra.mxu1 %v1671_v54  ;;  %v166_v33 = vld [vmem:[#allocation5 + $0x320] sm:$0x77]  ;;  %v167_v36 = vld [vmem:[#allocation5 + $0x328] sm:$0x77]  ;;  %v1636_v54 = vcombine.high %v69_v46, %v73_v47  ;;  %v1635_v60 = vcombine.low %v69_v46, %v73_v47  ;;  %v104_v12 = vld [vmem:[#allocation5 + $0x130] sm:$0xff] }
  0x53   :  { %765 = vmatprep.subr.bf16.mxu0 %v1678_v55  ;;  %806 = vmatprep.subr.bf16.mxu1 %v1680_v56  ;;  %v1726_v40 = vcombine.high %v162_v30, %v166_v33  ;;  %v1725_v41 = vcombine.low %v162_v30, %v166_v33  ;;  %v1728_v43 = vcombine.high %v163_v35, %v167_v36  ;;  %v77_v55 = vld [vmem:[#allocation5 + $0x58] sm:$0xff]  ;;  %v108_v19 = vld [vmem:[#allocation5 + $0x150] sm:$0xff] }
  0x54   :  { %v1727_v44 = vcombine.low %v163_v35, %v167_v36  ;;  %v2121_v56 = vpack.c.bf16 %v62_v45, %v62_v45  ;;  %v112_v20 = vld [vmem:[#allocation5 + $0x170] sm:$0xff]  ;;  %v109_v22 = vld [vmem:[#allocation5 + $0x158] sm:$0xff]  ;;  %v1665_v25 = vcombine.low %v100_v11, %v104_v12 }
  0x55   :  { %v730_v49 = vsel %vm728_vm1, %v1725_v41, 0  ;;  %v120_v27 = vld [vmem:[#allocation5 + $0x1b0] sm:$0xff]  ;;  %v117_v30 = vld [vmem:[#allocation5 + $0x198] sm:$0xff]  ;;  %v1673_v33 = vcombine.low %v108_v19, %v112_v20 }
  0x56   :  { %766 = vmatpush1.bf16.msra.mxu0 %v1677_v61  ;;  %807 = vmatpush1.bf16.msra.mxu1 %v1679_v62  ;;  %v736_v53 = vsel %vm728_vm1, %v1727_v44, 0  ;;  %v1642_v61 = vcombine.high %v76_v48, %v80_v52  ;;  %v88_v62 = vld [vmem:[#allocation5 + $0xb0] sm:$0xff]  ;;  %v125_v38 = vld [vmem:[#allocation5 + $0x1d8] sm:$0xff] }
  0x57   :  { %767 = vmatprep.subr.bf16.mxu0 %v1686_v63  ;;  %808 = vmatprep.subr.bf16.mxu1 %v1688_v0  ;;  %v1644_v63 = vcombine.high %v77_v55, %v81_v57  ;;  %v85_v0 = vld [vmem:[#allocation5 + $0x98] sm:$0xff]  ;;  %v1649_v10 = vcombine.low %v84_v59, %v88_v62  ;;  %v128_v35 = vld [vmem:[#allocation5 + $0x1f0] sm:$0xff] }
  0x58   :  { %v1652_v9 = vcombine.high %v85_v0, %v89_v1  ;;  %v132_v42 = vld [vmem:[#allocation5 + $0x210] sm:$0xff]  ;;  %v133_v46 = vld [vmem:[#allocation5 + $0x218] sm:$0xff] }
  0x59   :  { %v137_v47 = vld [vmem:[#allocation5 + $0x238] sm:$0xff]  ;;  %v144_v52 = vld [vmem:[#allocation5 + $0x270] sm:$0xff] }
  0x5a   :  { %768 = vmatpush1.bf16.msra.mxu0 %v1685_v5  ;;  %809 = vmatpush1.bf16.msra.mxu1 %v1687_v6  ;;  %v1643_v5 = vcombine.low %v77_v55, %v81_v57  ;;  %v1650_v6 = vcombine.high %v84_v59, %v88_v62  ;;  %v141_v55 = vld [vmem:[#allocation5 + $0x258] sm:$0xff] }
  0x5b   :  { %769 = vmatprep.subr.bf16.mxu0 %v1694_v7  ;;  %810 = vmatprep.subr.bf16.mxu1 %v1696_v8  ;;  %v93_v7 = vld [vmem:[#allocation5 + $0xd8] sm:$0xff] }
  0x5c   :  { %v97_v8 = vld [vmem:[#allocation5 + $0xf8] sm:$0xff] }
  0x5d   :  { %v1660_v17 = vcombine.high %v93_v7, %v97_v8  ;;  %v145_v57 = vld [vmem:[#allocation5 + $0x278] sm:$0xff] }
  0x5e   :  { %770 = vmatpush1.bf16.msra.mxu0 %v1693_v13  ;;  %811 = vmatpush1.bf16.msra.mxu1 %v1695_v14  ;;  %v1651_v13 = vcombine.low %v85_v0, %v89_v1  ;;  %v1658_v14 = vcombine.high %v92_v3, %v96_v4  ;;  %v1708_v62 = vcombine.high %v141_v55, %v145_v57  ;;  %v152_v0 = vld [vmem:[#allocation5 + $0x2b0] sm:$0xff]  ;;  %v149_v1 = vld [vmem:[#allocation5 + $0x298] sm:$0xff] }
  0x5f   :  { %771 = vmatprep.subr.bf16.mxu0 %v1702_v15  ;;  %812 = vmatprep.subr.bf16.mxu1 %v1704_v16  ;;  %v101_v15 = vld [vmem:[#allocation5 + $0x118] sm:$0xff]  ;;  %v1707_v4 = vcombine.low %v141_v55, %v145_v57 }
  0x60   :  { %v105_v16 = vld [vmem:[#allocation5 + $0x138] sm:$0xff] }
  0x61   :  { %v1667_v28 = vcombine.low %v101_v15, %v105_v16  ;;  %v1930_v55 = vld [vmem:[#allocation7 + $0xf8] sm:$0xff]  }
  0x62   :  { %772 = vmatpush1.bf16.msra.mxu0 %v1701_v21  ;;  %813 = vmatpush1.bf16.msra.mxu1 %v1703_v23  ;;  %v1659_v21 = vcombine.low %v93_v7, %v97_v8  ;;  %v113_v23 = vld [vmem:[#allocation5 + $0x178] sm:$0xff]  ;;  %v156_v7 = vld [vmem:[#allocation5 + $0x2d0] sm:$0xff] }
  0x63   :  { %773 = vmatprep.subr.bf16.mxu0 %v1710_v24  ;;  %814 = vmatprep.subr.bf16.mxu1 %v1712_v26  ;;  %v1668_v24 = vcombine.high %v101_v15, %v105_v16  ;;  %v116_v26 = vld [vmem:[#allocation5 + $0x190] sm:$0xff]  ;;  %v1675_v36 = vcombine.low %v109_v22, %v113_v23  ;;  %v1931_v57 = vld [vmem:[#allocation7 + $0x38] sm:$0xff]  }
  0x64   :  { %v1681_v41 = vcombine.low %v116_v26, %v120_v27  ;;  %v160_v8 = vld [vmem:[#allocation5 + $0x2f0] sm:$0xff] }
  0x65   :  { %v164_v15 = vld [vmem:[#allocation5 + $0x310] sm:$0xff] }
  0x66   :  { %774 = vmatpush1.bf16.msra.mxu0 %v1709_v29  ;;  %815 = vmatpush1.bf16.msra.mxu1 %v1711_v31  ;;  %v1674_v29 = vcombine.high %v108_v19, %v112_v20  ;;  %v121_v31 = vld [vmem:[#allocation5 + $0x1b8] sm:$0xff]  ;;  %v168_v16 = vld [vmem:[#allocation5 + $0x330] sm:$0x77]  ;;  %v1721_v19 = vcombine.low %v156_v7, %v160_v8 }
  0x67   :  { %775 = vmatprep.subr.bf16.mxu0 %v1718_v32  ;;  %816 = vmatprep.subr.bf16.mxu1 %v1720_v34  ;;  %v1676_v32 = vcombine.high %v109_v22, %v113_v23  ;;  %v124_v34 = vld [vmem:[#allocation5 + $0x1d0] sm:$0xff]  ;;  %v1683_v44 = vcombine.low %v117_v30, %v121_v31 }
  0x68   :  { %v1690_v45 = vcombine.high %v124_v34, %v128_v35 }
  0x6a   :  { %776 = vmatpush1.bf16.msra.mxu0 %v1717_v37  ;;  %817 = vmatpush1.bf16.msra.mxu1 %v1719_v39  ;;  %v1682_v37 = vcombine.high %v116_v26, %v120_v27  ;;  %v129_v39 = vld [vmem:[#allocation5 + $0x1f8] sm:$0xff]  ;;  %v1902_v27 = vld [vmem:[#allocation7 + $0xc0] sm:$0xff]  }
  0x6b   :  { %1733 = vmatprep.subr.msk.bf16.mxu0 %vm728_vm1, %v1726_v40  ;;  %1735 = vmatprep.subr.msk.bf16.mxu1 %vm728_vm1, %v1728_v43  ;;  %v1684_v40 = vcombine.high %v117_v30, %v121_v31  ;;  %v136_v43 = vld [vmem:[#allocation5 + $0x230] sm:$0xff]  ;;  %v1692_v48 = vcombine.high %v125_v38, %v129_v39  ;;  %v1905_v30 = vld [vmem:[#allocation7 + $0x48] sm:$0xff]  }
  0x6c   :  { %v1697_v59 = vcombine.low %v132_v42, %v136_v43  ;;  %v1906_v31 = vld [vmem:[#allocation7 + $0xc8] sm:$0xff]  }
  0x6e   :  { %778 = vmatpush1.bf16.msra.mxu0 %v730_v49  ;;  %819 = vmatpush1.bf16.msra.mxu1 %v736_v53  ;;  %v1689_v49 = vcombine.low %v124_v34, %v128_v35  ;;  %v1691_v53 = vcombine.low %v125_v38, %v129_v39  ;;  %v1909_v34 = vld [vmem:[#allocation7 + $0x50] sm:$0xff]   ;;  %v1913_v38 = vld [vmem:[#allocation7 + $0x58] sm:$0xff]  }
  0x6f   :  { %835 = vmatprep.subr.bf16.mxu0 %v1634_v51  ;;  %876 = vmatprep.subr.bf16.mxu1 %v1636_v54  ;;  %v140_v51 = vld [vmem:[#allocation5 + $0x250] sm:$0xff]  ;;  %v1698_v54 = vcombine.high %v132_v42, %v136_v43  ;;  %v1914_v39 = vld [vmem:[#allocation7 + $0xd8] sm:$0xff]   ;;  %v1918_v42 = vld [vmem:[#allocation7 + $0xe0] sm:$0xff]  }
  0x70   :  { %v1705_v3 = vcombine.low %v140_v51, %v144_v52  ;;  %v1910_v35 = vld [vmem:[#allocation7 + $0xd0] sm:$0xff]   ;;  %v1919_v43 = vld [vmem:[#allocation7 + $0x20] sm:$0xff]  }
  0x71   :  { %786 = vmatmul.mubr.bf16.vlgmr.msra.gmra.mrb[0].mxu0 %v2121_v56  ;;  %827 = vmatmul.mubr.bf16.vlgmr.msra.gmra.mrb[0].mxu1 %v2121_v56 }
  0x72   :  { %836 = vmatpush1.bf16.msra.mxu0 %v1633_v58  ;;  %877 = vmatpush1.bf16.msra.mxu1 %v1635_v60  ;;  %v1700_v58 = vcombine.high %v133_v46, %v137_v47  ;;  %v1699_v60 = vcombine.low %v133_v46, %v137_v47  ;;  %v1922_v46 = vld [vmem:[#allocation7 + $0xe8] sm:$0xff]  }
  0x73   :  { %837 = vmatprep.subr.bf16.mxu0 %v1642_v61  ;;  %878 = vmatprep.subr.bf16.mxu1 %v1644_v63  ;;  %v1706_v61 = vcombine.high %v140_v51, %v144_v52  ;;  %v148_v63 = vld [vmem:[#allocation5 + $0x290] sm:$0xff]  ;;  %v1923_v47 = vld [vmem:[#allocation7 + $0x28] sm:$0xff]  }
  0x74   :  { %1738 = vmatprep.mubr.msk.bf16.mxu0 %vm724_vm0, %v2111_v50  ;;  %1740 = vmatprep.mubr.msk.bf16.mxu1 %vm724_vm0, %v2111_v50  ;;  %v1666_v50 = vcombine.high %v100_v11, %v104_v12  ;;  %v1713_v11 = vcombine.low %v148_v63, %v152_v0  ;;  %v1926_v51 = vld [vmem:[#allocation7 + $0xf0] sm:$0xff]  }
  0x75   :  { %v1927_v52 = vld [vmem:[#allocation7 + $0x30] sm:$0xff]  }
  0x76   :  { %838 = vmatpush1.bf16.msra.mxu0 %v1641_v2  ;;  %879 = vmatpush1.bf16.msra.mxu1 %v1643_v5  ;;  %v153_v2 = vld [vmem:[#allocation5 + $0x2b8] sm:$0xff]  ;;  %v1714_v5 = vcombine.high %v148_v63, %v152_v0  ;;  %v2141_v0 = vld [vmem:[%s2163_s2] sm:$0xff] }
  0x77   :  { %839 = vmatprep.subr.bf16.mxu0 %v1650_v6  ;;  %880 = vmatprep.subr.bf16.mxu1 %v1652_v9  ;;  %v1716_v6 = vcombine.high %v149_v1, %v153_v2  ;;  %v157_v9 = vld [vmem:[#allocation5 + $0x2d8] sm:$0xff]  ;;  %v1715_v12 = vcombine.low %v149_v1, %v153_v2 }
  0x7a   :  { %840 = vmatpush1.bf16.msra.mxu0 %v1649_v10  ;;  %881 = vmatpush1.bf16.msra.mxu1 %v1651_v13  ;;  %v161_v10 = vld [vmem:[#allocation5 + $0x2f8] sm:$0xff]  ;;  %v1722_v13 = vcombine.high %v156_v7, %v160_v8 }
  0x7b   :  { %841 = vmatprep.subr.bf16.mxu0 %v1658_v14  ;;  %882 = vmatprep.subr.bf16.mxu1 %v1660_v17  ;;  %v1724_v14 = vcombine.high %v157_v9, %v161_v10  ;;  %v165_v17 = vld [vmem:[#allocation5 + $0x318] sm:$0xff]  ;;  %v1723_v20 = vcombine.low %v157_v9, %v161_v10 }
  0x7e   :  { %842 = vmatpush1.bf16.msra.mxu0 %v1657_v18  ;;  %883 = vmatpush1.bf16.msra.mxu1 %v1659_v21  ;;  %v169_v18 = vld [vmem:[#allocation5 + $0x338] sm:$0x77]  ;;  %v1730_v21 = vcombine.high %v164_v15, %v168_v16 }
  0x7f   :  { %843 = vmatprep.subr.bf16.mxu0 %v1666_v50  ;;  %884 = vmatprep.subr.bf16.mxu1 %v1668_v24  ;;  %v1729_v50 = vcombine.low %v164_v15, %v168_v16  ;;  %v1732_v22 = vcombine.high %v165_v17, %v169_v18  ;;  %v1731_v23 = vcombine.low %v165_v17, %v169_v18 }
  0x81   :  { %v742_v24 = vsel %vm728_vm1, %v1729_v50, 0  ;;  %v748_v26 = vsel %vm728_vm1, %v1731_v23, 0 }
  0x82   :  { %844 = vmatpush1.bf16.msra.mxu0 %v1665_v25  ;;  %885 = vmatpush1.bf16.msra.mxu1 %v1667_v28  ;;  %v1901_v25 = vld [vmem:[#allocation7 + $0x40] sm:$0xff]  }
  0x83   :  { %845 = vmatprep.subr.bf16.mxu0 %v1674_v29  ;;  %886 = vmatprep.subr.bf16.mxu1 %v1676_v32  ;;  %v1903_v28 = vld [vmem:[#allocation7] sm:$0xff]   ;;  %v1907_v32 = vld [vmem:[#allocation7 + $0x8] sm:$0xff]  }
  0x84   :  { %v1904_v29 = vld [vmem:[#allocation7 + $0x80] sm:$0xff]  }
  0x86   :  { %846 = vmatpush1.bf16.msra.mxu0 %v1673_v33  ;;  %887 = vmatpush1.bf16.msra.mxu1 %v1675_v36  ;;  %v1908_v33 = vld [vmem:[#allocation7 + $0x88] sm:$0xff]   ;;  %v1911_v36 = vld [vmem:[#allocation7 + $0x10] sm:$0xff]  }
  0x87   :  { %847 = vmatprep.subr.bf16.mxu0 %v1682_v37  ;;  %888 = vmatprep.subr.bf16.mxu1 %v1684_v40  ;;  %v1912_v37 = vld [vmem:[#allocation7 + $0x90] sm:$0xff]   ;;  %v1915_v40 = vld [vmem:[#allocation7 + $0x18] sm:$0xff]  }
  0x8a   :  { %848 = vmatpush1.bf16.msra.mxu0 %v1681_v41  ;;  %889 = vmatpush1.bf16.msra.mxu1 %v1683_v44  ;;  %v1917_v41 = vld [vmem:[#allocation7 + $0x60] sm:$0xff]  }
  0x8b   :  { %849 = vmatprep.subr.bf16.mxu0 %v1690_v45  ;;  %890 = vmatprep.subr.bf16.mxu1 %v1692_v48  ;;  %v1920_v44 = vld [vmem:[#allocation7 + $0xa0] sm:$0xff]   ;;  %v1921_v45 = vld [vmem:[#allocation7 + $0x68] sm:$0xff]  }
  0x8c   :  { %v1924_v48 = vld [vmem:[#allocation7 + $0xa8] sm:$0xff]  }
  0x8e   :  { %850 = vmatpush1.bf16.msra.mxu0 %v1689_v49  ;;  %891 = vmatpush1.bf16.msra.mxu1 %v1691_v53  ;;  %v1925_v49 = vld [vmem:[#allocation7 + $0x70] sm:$0xff]  }
  0x8f   :  { %851 = vmatprep.subr.bf16.mxu0 %v1698_v54  ;;  %892 = vmatprep.subr.bf16.mxu1 %v1700_v58  ;;  %v1928_v53 = vld [vmem:[#allocation7 + $0xb0] sm:$0xff]   ;;  %v1929_v54 = vld [vmem:[#allocation7 + $0x78] sm:$0xff]  }
  0x90   :  { %v1932_v58 = vld [vmem:[#allocation7 + $0xb8] sm:$0xff]  }
  0x92   :  { %852 = vmatpush1.bf16.msra.mxu0 %v1697_v59  ;;  %893 = vmatpush1.bf16.msra.mxu1 %v1699_v60  ;;  %v1933_v59 = vld [vmem:[#allocation7 + $0x140] sm:$0xff]  }
  0x93   :  { %853 = vmatprep.subr.bf16.mxu0 %v1706_v61  ;;  %894 = vmatprep.subr.bf16.mxu1 %v1708_v62  ;;  %v1934_v60 = vld [vmem:[#allocation7 + $0x1c0] sm:$0xff]   ;;  %v172_v61 = vlaneseq }
  0x95   :  { %v2135_v62 = vshrl.u32 %v172_v61, 7  ;;  %v1964_v61 = vld [vmem:[#allocation7 + $0x1b8] sm:$0xff]  }
  0x96   :  { %854 = vmatpush1.bf16.msra.mxu0 %v1705_v3  ;;  %895 = vmatpush1.bf16.msra.mxu1 %v1707_v4 }
  0x97   :  { %855 = vmatprep.subr.bf16.mxu0 %v1714_v5  ;;  %896 = vmatprep.subr.bf16.mxu1 %v1716_v6  ;;  %v174_v63 = vsub.s32 0, %v2135_v62  ;;  %v182_v1 = vsub.s32 2, %v2135_v62  ;;  %v178_v2 = vsub.s32 1, %v2135_v62  ;;  %v186_v3 = vsub.s32 3, %v2135_v62 }
  0x99   :  { %v175_v4 = vrot.slane %v2141_v0, %v174_v63  ;;  %v183_v5 = vrot.slane %v2141_v0, %v182_v1  ;;  %v179_v6 = vrot.slane %v2141_v0, %v178_v2  ;;  %v187_v7 = vrot.slane %v2141_v0, %v186_v3 }
  0x9a   :  { %856 = vmatpush1.bf16.msra.mxu0 %v1713_v11  ;;  %897 = vmatpush1.bf16.msra.mxu1 %v1715_v12  ;;  %v190_v63 = vsub.s32 4, %v2135_v62  ;;  %v198_v1 = vsub.s32 6, %v2135_v62  ;;  %v194_v2 = vsub.s32 5, %v2135_v62  ;;  %v202_v3 = vsub.s32 7, %v2135_v62 }
  0x9b   :  { %857 = vmatprep.subr.bf16.mxu0 %v1722_v13  ;;  %898 = vmatprep.subr.bf16.mxu1 %v1724_v14 }
  0x9e   :  { %858 = vmatpush1.bf16.msra.mxu0 %v1721_v19  ;;  %899 = vmatpush1.bf16.msra.mxu1 %v1723_v20 }
  0x9f   :  { %1737 = vmatprep.subr.msk.bf16.mxu0 %vm728_vm1, %v1730_v21  ;;  %1739 = vmatprep.subr.msk.bf16.mxu1 %vm728_vm1, %v1732_v22 }
  0xa2   :  { %860 = vmatpush1.bf16.msra.mxu0 %v742_v24  ;;  %901 = vmatpush1.bf16.msra.mxu1 %v748_v26 }
  0xa3   :  { %1806 = vmatprep.subr.bf16.mxu0 %v1901_v25  ;;  %1828 = vmatprep.subr.bf16.mxu1 %v1902_v27 }
  0xa5   :  { %868 = vmatmul.mubr.bf16.vlgmr.msra.gmra.mrb[4].mxu0 %v2121_v56  ;;  %909 = vmatmul.mubr.bf16.vlgmr.msra.gmra.mrb[4].mxu1 %v2121_v56  ;;  %v1916_v56 = vld [vmem:[#allocation7 + $0x98] sm:$0xff]  }
  0xa6   :  { %1807 = vmatpush3.bf16.msra.mxu0 %v1903_v28  ;;  %1829 = vmatpush3.bf16.msra.mxu1 %v1904_v29  ;;  %v1935_v29 = vld [vmem:[#allocation7 + $0x100] sm:$0xff]  }
  0xa7   :  { %1808 = vmatprep.subr.bf16.mxu0 %v1905_v30  ;;  %1830 = vmatprep.subr.bf16.mxu1 %v1906_v31 }
  0xaa   :  { %1809 = vmatpush3.bf16.msra.mxu0 %v1907_v32  ;;  %1831 = vmatpush3.bf16.msra.mxu1 %v1908_v33  ;;  %v1936_v32 = vld [vmem:[#allocation7 + $0x180] sm:$0xff]   ;;  %v1937_v33 = vld [vmem:[#allocation7 + $0x148] sm:$0xff]  }
  0xab   :  { %1810 = vmatprep.subr.bf16.mxu0 %v1909_v34  ;;  %1832 = vmatprep.subr.bf16.mxu1 %v1910_v35  ;;  %v1938_v34 = vld [vmem:[#allocation7 + $0x1c8] sm:$0xff]  }
  0xac   :  { %v1939_v35 = vld [vmem:[#allocation7 + $0x108] sm:$0xff]  }
  0xae   :  { %1811 = vmatpush3.bf16.msra.mxu0 %v1911_v36  ;;  %1833 = vmatpush3.bf16.msra.mxu1 %v1912_v37  ;;  %v1940_v36 = vld [vmem:[#allocation7 + $0x188] sm:$0xff]   ;;  %v1941_v37 = vld [vmem:[#allocation7 + $0x150] sm:$0xff]  }
  0xaf   :  { %1812 = vmatprep.subr.bf16.mxu0 %v1913_v38  ;;  %1834 = vmatprep.subr.bf16.mxu1 %v1914_v39  ;;  %v1942_v38 = vld [vmem:[#allocation7 + $0x1d0] sm:$0xff]  }
  0xb0   :  { %v1943_v39 = vld [vmem:[#allocation7 + $0x110] sm:$0xff]  }
  0xb2   :  { %1813 = vmatpush3.bf16.msra.mxu0 %v1915_v40  ;;  %1835 = vmatpush3.bf16.msra.mxu1 %v1916_v56  ;;  %v1944_v40 = vld [vmem:[#allocation7 + $0x190] sm:$0xff]   ;;  %v1945_v56 = vld [vmem:[#allocation7 + $0x158] sm:$0xff]  }
  0xb3   :  { %1814 = vmatprep.subr.bf16.mxu0 %v1917_v41  ;;  %1836 = vmatprep.subr.bf16.mxu1 %v1918_v42  ;;  %v1946_v41 = vld [vmem:[#allocation7 + $0x1d8] sm:$0xff]  }
  0xb4   :  { %v1947_v42 = vld [vmem:[#allocation7 + $0x118] sm:$0xff]  }
  0xb6   :  { %1815 = vmatpush3.bf16.msra.mxu0 %v1919_v43  ;;  %1837 = vmatpush3.bf16.msra.mxu1 %v1920_v44  ;;  %v1948_v43 = vld [vmem:[#allocation7 + $0x198] sm:$0xff]   ;;  %v1949_v44 = vld [vmem:[#allocation7 + $0x160] sm:$0xff]  }
  0xb7   :  { %1816 = vmatprep.subr.bf16.mxu0 %v1921_v45  ;;  %1838 = vmatprep.subr.bf16.mxu1 %v1922_v46  ;;  %v1950_v45 = vld [vmem:[#allocation7 + $0x1e0] sm:$0xff]  }
  0xb8   :  { %v1951_v46 = vld [vmem:[#allocation7 + $0x120] sm:$0xff]  }
  0xba   :  { %1817 = vmatpush3.bf16.msra.mxu0 %v1923_v47  ;;  %1839 = vmatpush3.bf16.msra.mxu1 %v1924_v48  ;;  %v1952_v47 = vld [vmem:[#allocation7 + $0x1a0] sm:$0xff]   ;;  %v1953_v48 = vld [vmem:[#allocation7 + $0x168] sm:$0xff]  }
  0xbb   :  { %1818 = vmatprep.subr.bf16.mxu0 %v1925_v49  ;;  %1840 = vmatprep.subr.bf16.mxu1 %v1926_v51  ;;  %v1954_v49 = vld [vmem:[#allocation7 + $0x1e8] sm:$0xff]  }
  0xbc   :  { %v1955_v51 = vld [vmem:[#allocation7 + $0x128] sm:$0xff]  }
  0xbe   :  { %1819 = vmatpush3.bf16.msra.mxu0 %v1927_v52  ;;  %1841 = vmatpush3.bf16.msra.mxu1 %v1928_v53  ;;  %v1956_v52 = vld [vmem:[#allocation7 + $0x1a8] sm:$0xff]   ;;  %v1957_v53 = vld [vmem:[#allocation7 + $0x170] sm:$0xff]  }
  0xbf   :  { %1820 = vmatprep.subr.bf16.mxu0 %v1929_v54  ;;  %1842 = vmatprep.subr.bf16.mxu1 %v1930_v55  ;;  %v1958_v54 = vld [vmem:[#allocation7 + $0x1f0] sm:$0xff]  }
  0xc0   :  { %v1959_v55 = vld [vmem:[#allocation7 + $0x130] sm:$0xff]  }
  0xc2   :  { %1821 = vmatpush3.bf16.msra.mxu0 %v1931_v57  ;;  %1843 = vmatpush3.bf16.msra.mxu1 %v1932_v58  ;;  %v1960_v57 = vld [vmem:[#allocation7 + $0x1b0] sm:$0xff]   ;;  %v1961_v58 = vld [vmem:[#allocation7 + $0x178] sm:$0xff]  }
  0xc3   :  { %1850 = vmatprep.subr.bf16.mxu0 %v1933_v59  ;;  %1872 = vmatprep.subr.bf16.mxu1 %v1934_v60  ;;  %v1962_v59 = vld [vmem:[#allocation7 + $0x1f8] sm:$0xff]  }
  0xc4   :  { %v1963_v60 = vld [vmem:[#allocation7 + $0x138] sm:$0xff]  }
 0x144   :  { %v787_v8 = vpop.f32.mrb[0].mxu0  ;;  %v828_v10 = vpop.f32.mrb[0].mxu1 }
 0x145   :  { %v788_v9 = vadd.f32 %v787_v8, %v175_v4  ;;  %v789_v11 = vpop.f32.mrb[1].mxu0  ;;  %v829_v12 = vadd.f32 %v828_v10, %v183_v5  ;;  %v830_v14 = vpop.f32.mrb[1].mxu1  ;;  %v191_v4 = vrot.slane %v2141_v0, %v190_v63  ;;  %v199_v5 = vrot.slane %v2141_v0, %v198_v1 }
 0x146   :  { %v790_v13 = vadd.f32 %v789_v11, %v179_v6  ;;  %v791_v15 = vpop.f32.mrb[2].mxu0  ;;  %v831_v17 = vadd.f32 %v830_v14, %v187_v7  ;;  %v832_v18 = vpop.f32.mrb[2].mxu1  ;;  %v195_v6 = vrot.slane %v2141_v0, %v194_v2  ;;  %v203_v7 = vrot.slane %v2141_v0, %v202_v3 }
 0x147   :  { %v917_v16 = vmul.f32 0.18181819, %v788_v9  ;;  %v792_v19 = vpop.f32.mrb[3].mxu0  ;;  %v919_v20 = vmul.f32 0.18181819, %v829_v12  ;;  %v833_v50 = vpop.f32.mrb[3].mxu1 }
 0x148   :  { %v918_v21 = vmul.f32 0.18181819, %v790_v13  ;;  %v920_v23 = vmul.f32 0.18181819, %v831_v17 }
 0x149   :  { %v925_v22 = vmax.f32 %v788_v9, %v917_v16  ;;  %v927_v24 = vmax.f32 %v829_v12, %v919_v20 }
 0x14a   :  { %v926_v25 = vmax.f32 %v790_v13, %v918_v21  ;;  %v928_v26 = vmax.f32 %v831_v17, %v920_v23 }
 0x14b   :  { %v935_v27 = vpack.c.bf16 %v927_v24, %v927_v24  ;;  %v933_v30 = vpack.c.bf16 %v925_v22, %v925_v22 }
 0x14c   :  { %v934_v28 = vpack.c.bf16 %v926_v25, %v926_v25  ;;  %v936_v31 = vpack.c.bf16 %v928_v26, %v928_v26 }
 0x14e   :  { %1485 = vmatprep.mubr.bf16.mxu0 %v934_v28  ;;  %1525 = vmatprep.mubr.bf16.mxu1 %v936_v31 }
 0x14f   :  { %1486 = vmatmul.mubr.bf16.vlgmr.msra.gmra.mrb[8].mxu0 %v933_v30  ;;  %1526 = vmatmul.mubr.bf16.vlgmr.msra.gmra.mrb[8].mxu1 %v935_v27 }
 0x150   :  { %1851 = vmatpush3.bf16.msra.mxu0 %v1935_v29  ;;  %1873 = vmatpush3.bf16.msra.mxu1 %v1936_v32 }
 0x151   :  { %1852 = vmatprep.subr.bf16.mxu0 %v1937_v33  ;;  %1874 = vmatprep.subr.bf16.mxu1 %v1938_v34 }
 0x154   :  { %1853 = vmatpush3.bf16.msra.mxu0 %v1939_v35  ;;  %1875 = vmatpush3.bf16.msra.mxu1 %v1940_v36 }
 0x155   :  { %1854 = vmatprep.subr.bf16.mxu0 %v1941_v37  ;;  %1876 = vmatprep.subr.bf16.mxu1 %v1942_v38 }
 0x158   :  { %1855 = vmatpush3.bf16.msra.mxu0 %v1943_v39  ;;  %1877 = vmatpush3.bf16.msra.mxu1 %v1944_v40 }
 0x159   :  { %1856 = vmatprep.subr.bf16.mxu0 %v1945_v56  ;;  %1878 = vmatprep.subr.bf16.mxu1 %v1946_v41 }
 0x15c   :  { %1857 = vmatpush3.bf16.msra.mxu0 %v1947_v42  ;;  %1879 = vmatpush3.bf16.msra.mxu1 %v1948_v43 }
 0x15d   :  { %1858 = vmatprep.subr.bf16.mxu0 %v1949_v44  ;;  %1880 = vmatprep.subr.bf16.mxu1 %v1950_v45 }
 0x160   :  { %1859 = vmatpush3.bf16.msra.mxu0 %v1951_v46  ;;  %1881 = vmatpush3.bf16.msra.mxu1 %v1952_v47 }
 0x161   :  { %1860 = vmatprep.subr.bf16.mxu0 %v1953_v48  ;;  %1882 = vmatprep.subr.bf16.mxu1 %v1954_v49 }
 0x164   :  { %1861 = vmatpush3.bf16.msra.mxu0 %v1955_v51  ;;  %1883 = vmatpush3.bf16.msra.mxu1 %v1956_v52  ;;  %v1805_v51 = vld [vmem:[#allocation2] ss:$0 sm:$0xff] }
 0x165   :  { %1862 = vmatprep.subr.bf16.mxu0 %v1957_v53  ;;  %1884 = vmatprep.subr.bf16.mxu1 %v1958_v54 }
 0x168   :  { %1863 = vmatpush3.bf16.msra.mxu0 %v1959_v55  ;;  %1885 = vmatpush3.bf16.msra.mxu1 %v1960_v57 }
 0x169   :  { %1864 = vmatprep.subr.bf16.mxu0 %v1961_v58  ;;  %1886 = vmatprep.subr.bf16.mxu1 %v1962_v59 }
 0x16c   :  { %1865 = vmatpush3.bf16.msra.mxu0 %v1963_v60  ;;  %1887 = vmatpush3.bf16.msra.mxu1 %v1964_v61 }
 0x178   :  { %v869_v8 = vpop.f32.mrb[4].mxu0  ;;  %v910_v10 = vpop.f32.mrb[4].mxu1 }
 0x179   :  { %v870_v9 = vadd.f32 %v869_v8, %v191_v4  ;;  %v871_v11 = vpop.f32.mrb[5].mxu0  ;;  %v911_v12 = vadd.f32 %v910_v10, %v199_v5  ;;  %v912_v14 = vpop.f32.mrb[5].mxu1 }
 0x17a   :  { %v872_v13 = vadd.f32 %v871_v11, %v195_v6  ;;  %v873_v15 = vpop.f32.mrb[6].mxu0  ;;  %v913_v17 = vadd.f32 %v912_v14, %v203_v7  ;;  %v914_v18 = vpop.f32.mrb[6].mxu1 }
 0x17b   :  { %v921_v16 = vmul.f32 0.18181819, %v870_v9  ;;  %v874_v62 = vpop.f32.mrb[7].mxu0  ;;  %v923_v19 = vmul.f32 0.18181819, %v911_v12  ;;  %v915_v21 = vpop.f32.mrb[7].mxu1 }
 0x17c   :  { %v922_v20 = vmul.f32 0.18181819, %v872_v13  ;;  %v924_v22 = vmul.f32 0.18181819, %v913_v17 }
 0x17d   :  { %v929_v50 = vmax.f32 %v870_v9, %v921_v16  ;;  %v931_v23 = vmax.f32 %v911_v12, %v923_v19 }
 0x17e   :  { %v930_v24 = vmax.f32 %v872_v13, %v922_v20  ;;  %v932_v0 = vmax.f32 %v913_v17, %v924_v22 }
 0x17f   :  { %v937_v26 = vpack.c.bf16 %v929_v50, %v929_v50  ;;  %v939_v28 = vpack.c.bf16 %v931_v23, %v931_v23 }
 0x180   :  { %v938_v25 = vpack.c.bf16 %v930_v24, %v930_v24  ;;  %v940_v27 = vpack.c.bf16 %v932_v0, %v932_v0 }
 0x182   :  { %1565 = vmatprep.mubr.bf16.mxu0 %v938_v25  ;;  %1605 = vmatprep.mubr.bf16.mxu1 %v940_v27 }
 0x183   :  { %1566 = vmatmul.mubr.bf16.vlgmr.msra.gmra.mrb[12].mxu0 %v937_v26  ;;  %1606 = vmatmul.mubr.bf16.vlgmr.msra.gmra.mrb[12].mxu1 %v939_v28 }
 0x222   :  { %v1822_v29 = vpop.f32.mrb[8].mxu0  ;;  %v1844_v30 = vpop.f32.mrb[8].mxu1 }
 0x223   :  { %v1823_v31 = vpop.f32.mrb[9].mxu0  ;;  %v1845_v33 = vpop.f32.mrb[9].mxu1 }
 0x224   :  { %v1824_v32 = vadd.f32 %v1823_v31, %v1822_v29  ;;  %v1825_v34 = vpop.f32.mrb[10].mxu0  ;;  %v1846_v35 = vadd.f32 %v1845_v33, %v1844_v30  ;;  %v1847_v36 = vpop.f32.mrb[10].mxu1 }
 0x225   :  { %v1826_v37 = vpop.f32.mrb[11].mxu0  ;;  %v1848_v38 = vpop.f32.mrb[11].mxu1 }
 0x226   :  { %v1528_v39 = vadd.f32 %v1846_v35, %v1824_v32 }
 0x256   :  { %v1866_v40 = vpop.f32.mrb[12].mxu0  ;;  %v1888_v56 = vpop.f32.mrb[12].mxu1 }
 0x257   :  { %v1867_v41 = vpop.f32.mrb[13].mxu0  ;;  %v1889_v43 = vpop.f32.mrb[13].mxu1 }
 0x258   :  { %v1868_v42 = vadd.f32 %v1867_v41, %v1866_v40  ;;  %v1869_v44 = vpop.f32.mrb[14].mxu0  ;;  %v1890_v45 = vadd.f32 %v1889_v43, %v1888_v56  ;;  %v1891_v46 = vpop.f32.mrb[14].mxu1 }
 0x259   :  { %v1870_v47 = vpop.f32.mrb[15].mxu0  ;;  %v1892_v49 = vpop.f32.mrb[15].mxu1 }
 0x25a   :  { %v1568_v48 = vadd.f32 %v1868_v42, %v1528_v39 }
 0x25c   :  { %v1608_v52 = vadd.f32 %v1890_v45, %v1568_v48 }
 0x25e   :  { %v1620_v53 = vadd.f32 %v1805_v51, %v1608_v52 }
 0x260   :  { %1622 = vst.msk [vmem:[%s2166_s5] sm:$0xff] %vm1621_vm2, %v1620_v53 }
 0x261   :  { %1627 = vsyncpa [#allocation4], 1 }
 0x262   :  { %1628 = vsyncpa [#allocation6], 1 }

</bundles_post_ra>
